<compile_context>
chip_gen: v6e
topology: v6e:2x2x1
jax: 0.10.0
libtpu: 0.0.40
codegen_flags: <defaults>
</compile_context>

<pallas_src>
import functools

import jax
import jax.numpy as jnp
from jax import lax
from jax.experimental import pallas as pl
from jax.experimental.pallas import tpu as pltpu


def _focal_loss_kernel(target_ref, logits_ref, out_ref, *,
                       gamma, block_n, num_splits, total_n):
    c = pl.program_id(0)          # split (TensorCore shard on v7x)
    i = pl.program_id(1)          # row-block within split (reduction axis)

    @pl.when(i == 0)
    def _():
        out_ref[...] = jnp.zeros_like(out_ref)

    logits = logits_ref[...].astype(jnp.float32)              # [bn, C] f32
    tgt = target_ref[...]                                      # [bn, 1] int32

    # Numerically stable log-softmax pieces; only the gathered column is kept.
    m = jnp.max(logits, axis=-1, keepdims=True)                # [bn, 1]
    shifted = logits - m                                        # [bn, C]
    lse = jnp.log(jnp.sum(jnp.exp(shifted), axis=-1, keepdims=True))  # [bn, 1]

    # gather(-1, target): broadcast a [1, C] lane iota against the [bn, 1]
    # target column -> single full-tile compare+select (no [bn, C] int32
    # iota materialized per step).
    cls_idx = lax.broadcasted_iota(jnp.int32, (1, shifted.shape[-1]), 1)
    gathered = jnp.sum(jnp.where(cls_idx == tgt, shifted, 0.0),
                       axis=-1, keepdims=True)                  # [bn, 1]
    log_prob = gathered - lse                                   # [bn, 1]

    prob = jnp.exp(log_prob)    # detached in torch; forward value identical
    if isinstance(gamma, int) and not isinstance(gamma, bool):
        focal_w = lax.integer_pow(1.0 - prob, gamma)            # gamma=2 -> mul
    else:
        # Clamp: FP rounding can make prob marginally > 1 -> NaN in the pow.
        focal_w = jnp.maximum(1.0 - prob, 0.0) ** gamma
    loss = -focal_w * log_prob                                  # [bn, 1]

    # Mask OOB-garbage / redundant rows using the LOGICAL (unclamped) global
    # row index derived from program ids only (never from loaded data).
    row0 = (i * num_splits + c) * block_n
    row = row0 + lax.broadcasted_iota(jnp.int32, loss.shape, 0)
    loss = jnp.where(row < total_n, loss, 0.0)

    out_ref[...] += jnp.sum(loss)                               # per-split partial


def _tpu_config():
    """Generation-aware (vmem_limit_bytes, per-tile VMEM budget)."""
    phys_vmem = 128 * 1024 * 1024
    try:
        info = pltpu.get_tpu_info()
        phys_vmem = int(getattr(info, "vmem_capacity_bytes", phys_vmem))
    except Exception:
        pass
    if phys_vmem >= 96 * 1024 * 1024:          # v5e / v6e: 128 MiB physical
        return 64 * 1024 * 1024, 28 * 1024 * 1024
    else:                                       # v7x: 64 MiB per TensorCore
        return 32 * 1024 * 1024, 22 * 1024 * 1024


def _num_tensorcores():
    """2 on v7x (megacore sharding of the 'parallel' axis), else 1."""
    try:
        kind = jax.devices()[0].device_kind.lower()
    except Exception:
        return 1
    return 2 if ("v7" in kind or "tpu7" in kind) else 1


def _choose_block_n(n, c, itemsize, tile_budget):
    """Largest row tile whose working set fits the per-tile VMEM budget."""
    c_pad = -(-c // 128) * 128
    # Per row of block_n:
    #  * logits input tile, double-buffered, at input dtype: 2 * c_pad * itemsize
    #  * ~5 live full-width f32/int32-sized temporaries (f32 upcast, shifted,
    #    exp(shifted), compare/select result, fusion slack)
    #  * (block_n, 1) int32 target tile: pads to 128 lanes under (8,128)
    #    tiling and is double-buffered -> 2 * 128 * 4 B per row
    bytes_per_row = c_pad * (2 * itemsize + 5 * 4) + 2 * 128 * 4
    bn = tile_budget // bytes_per_row
    n_pad8 = -(-n // 8) * 8
    bn = min(bn, n_pad8)
    bn = max(8, (bn // 8) * 8)     # sublane multiple
    return bn


def focal_loss(target, logits, *, gamma=2, reduction="mean",
               block_n=None, num_splits=None):
    """target: [N] int, logits: [N, C] float (f32 or bf16). Scalar loss."""
    N, C = logits.shape
    itemsize = jnp.dtype(logits.dtype).itemsize
    vmem_limit, tile_budget = _tpu_config()
    if block_n is None:
        block_n = _choose_block_n(N, C, itemsize, tile_budget)
    assert block_n % 8 == 0

    blocks_total = -(-N // block_n)
    if num_splits is None:
        num_splits = _num_tensorcores()
    num_splits = max(1, min(num_splits, blocks_total))
    bps = -(-blocks_total // num_splits)            # row-blocks per split

    target2d = target.astype(jnp.int32).reshape(N, 1)

    kernel = functools.partial(
        _focal_loss_kernel, gamma=gamma, block_n=block_n,
        num_splits=num_splits, total_n=N)

    last_block = blocks_total - 1
    if num_splits == 1:
        row_block = lambda c, i: (i, 0)
    else:
        # Round-robin interleave blocks across TensorCores; redundant trailing
        # steps (when blocks_total % num_splits != 0) are clamped onto the last
        # real block and contribute zero via the in-kernel logical row mask.
        row_block = lambda c, i: (jnp.minimum(i * num_splits + c, last_block), 0)

    partials = pl.pallas_call(
        kernel,
        out_shape=jax.ShapeDtypeStruct((num_splits, 1, 1), jnp.float32),
        grid_spec=pltpu.PrefetchScalarGridSpec(
            num_scalar_prefetch=0,
            grid=(num_splits, bps),
            in_specs=[
                pl.BlockSpec((block_n, 1), row_block),
                pl.BlockSpec((block_n, C), row_block),
            ],
            out_specs=pl.BlockSpec((1, 1, 1), lambda c, i: (c, 0, 0)),
        ),
        compiler_params=pltpu.CompilerParams(
            dimension_semantics=("parallel", "arbitrary"),
            vmem_limit_bytes=vmem_limit,
        ),
    )(target2d, logits)

    total = jnp.sum(partials)
    if reduction == "sum":
        return total
    if reduction == "mean":
        return total / jnp.float32(N)
    raise ValueError("Invalid reduction (only 'mean'/'sum' supported)")


def _focal_loss_ref(target, logits, gamma=2):
    log_softmax = jax.nn.log_softmax(logits.astype(jnp.float32), axis=-1)
    log_prob = jnp.take_along_axis(
        log_softmax, target[:, None].astype(jnp.int32), axis=-1)
    prob = jnp.exp(log_prob)
    loss = -((1.0 - prob) ** gamma) * log_prob
    return jnp.mean(loss)


if __name__ == "__main__":
    key = jax.random.PRNGKey(0)
    k1, k2, k3, k4, k5, k6 = jax.random.split(key, 6)

    # Small shapes consistent with the module: N rows, C classes.
    N, C = 8, 32
    logits = jax.random.normal(k1, (N, C), dtype=jnp.float32)
    target = jax.random.randint(k2, (N,), 0, C, dtype=jnp.int32)
    out = jax.block_until_ready(focal_loss(target, logits, gamma=2))
    ref = _focal_loss_ref(target, logits, gamma=2)
    assert jnp.allclose(out, ref, rtol=1e-5, atol=1e-5), (out, ref)

    # Non-divisible N: exercises the unpadded partial trailing block + row mask.
    N2, C2 = 10, 32
    logits2 = jax.random.normal(k3, (N2, C2), dtype=jnp.float32)
    target2 = jax.random.randint(k4, (N2,), 0, C2, dtype=jnp.int32)
    out2 = jax.block_until_ready(focal_loss(target2, logits2, gamma=2))
    ref2 = _focal_loss_ref(target2, logits2, gamma=2)
    assert jnp.allclose(out2, ref2, rtol=1e-5, atol=1e-5), (out2, ref2)

    # Multi-block accumulation + partial trailing block + forced 2-way
    # round-robin split with a clamped redundant trailing step.
    N3, C3 = 300, 40
    logits3 = jax.random.normal(k5, (N3, C3), dtype=jnp.float32)
    target3 = jax.random.randint(k6, (N3,), 0, C3, dtype=jnp.int32)
    out3 = jax.block_until_ready(
        focal_loss(target3, logits3, gamma=2, block_n=64, num_splits=2))
    ref3 = _focal_loss_ref(target3, logits3, gamma=2)
    assert jnp.allclose(out3, ref3, rtol=1e-5, atol=1e-5), (out3, ref3)

    print("KERNEL_OK")
</pallas_src>

<mosaic_0001>
module attributes {stable_mosaic.version = 11 : i64} {
  func.func @_focal_loss_kernel(%arg0: i32, %arg1: i32, %arg2: memref<8x1xi32, #tpu.memory_space<vmem>>, %arg3: memref<8x32xf32, #tpu.memory_space<vmem>>, %arg4: memref<1x1x1xf32, #tpu.memory_space<vmem>>) attributes {dimension_semantics = [#tpu.dimension_semantics<parallel>, #tpu.dimension_semantics<arbitrary>], iteration_bounds = array<i64: 1, 1>, scalar_prefetch = 0 : i64, scratch_operands = 0 : i64, tpu.core_type = #tpu.core_type<tc>, window_params = [{transform_indices = @transform_0, window_bounds = array<i64: 8, 1>}, {transform_indices = @transform_1, window_bounds = array<i64: 8, 32>}, {transform_indices = @transform_2, window_bounds = array<i64: 1, 1, 1>}]} {
    %c0_i32 = arith.constant 0 : i32
    %0 = arith.cmpi eq, %arg1, %c0_i32 : i32
    %1 = arith.extui %0 : i1 to i32
    %c0_i32_0 = arith.constant 0 : i32
    %2 = arith.cmpi ne, %1, %c0_i32_0 : i32
    scf.if %2 {
      %cst_18 = arith.constant 0.000000e+00 : f32
      %47 = vector.broadcast %cst_18 : f32 to vector<1x1x1xf32>
      %c0_19 = arith.constant 0 : index
      %c0_20 = arith.constant 0 : index
      %c0_21 = arith.constant 0 : index
      %48 = vector.load %arg4[%c0_19, %c0_20, %c0_21] : memref<1x1x1xf32, #tpu.memory_space<vmem>>, vector<1x1x1xf32>
      tpu.vector_store %arg4[%c0_19, %c0_20, %c0_21], %47 {strides = array<i32>} : memref<1x1x1xf32, #tpu.memory_space<vmem>>, vector<1x1x1xf32>,
    } else {
    }
    %c0 = arith.constant 0 : index
    %c0_1 = arith.constant 0 : index
    %3 = vector.load %arg3[%c0, %c0_1] : memref<8x32xf32, #tpu.memory_space<vmem>>, vector<8x32xf32>
    %c0_2 = arith.constant 0 : index
    %c0_3 = arith.constant 0 : index
    %4 = vector.load %arg2[%c0_2, %c0_3] : memref<8x1xi32, #tpu.memory_space<vmem>>, vector<8x1xi32>
    %cst = arith.constant dense<0xFF800000> : vector<8xf32>
    %5 = vector.multi_reduction <maximumf>, %3, %cst [1] : vector<8x32xf32> to vector<8xf32>
    %6 = vector.shape_cast %5 : vector<8xf32> to vector<8x1xf32>
    %7 = vector.broadcast %6 : vector<8x1xf32> to vector<8x32xf32>
    %8 = arith.subf %3, %7 : vector<8x32xf32>
    %9 = math.exp %8 : vector<8x32xf32>
    %cst_4 = arith.constant dense<0.000000e+00> : vector<8xf32>
    %10 = vector.multi_reduction <add>, %9, %cst_4 [1] : vector<8x32xf32> to vector<8xf32>
    %11 = vector.shape_cast %10 : vector<8xf32> to vector<8x1xf32>
    %12 = math.log %11 : vector<8x1xf32>
    %13 = tpu.iota {dimensions = array<i32: 1>} : vector<1x32xi32>
    %14 = vector.broadcast %13 : vector<1x32xi32> to vector<8x32xi32>
    %15 = vector.broadcast %4 : vector<8x1xi32> to vector<8x32xi32>
    %16 = arith.cmpi eq, %14, %15 : vector<8x32xi32>
    %cst_5 = arith.constant 0.000000e+00 : f32
    %17 = vector.broadcast %cst_5 : f32 to vector<8x32xf32>
    %18 = arith.select %16, %8, %17 : vector<8x32xi1>, vector<8x32xf32>
    %cst_6 = arith.constant dense<0.000000e+00> : vector<8xf32>
    %19 = vector.multi_reduction <add>, %18, %cst_6 [1] : vector<8x32xf32> to vector<8xf32>
    %20 = vector.shape_cast %19 : vector<8xf32> to vector<8x1xf32>
    %21 = arith.subf %20, %12 : vector<8x1xf32>
    %22 = math.exp %21 : vector<8x1xf32>
    %cst_7 = arith.constant 1.000000e+00 : f32
    %23 = vector.broadcast %cst_7 : f32 to vector<8x1xf32>
    %24 = arith.subf %23, %22 : vector<8x1xf32>
    %25 = arith.mulf %24, %24 : vector<8x1xf32>
    %cst_8 = arith.constant 0.000000e+00 : f32
    %26 = vector.broadcast %cst_8 : f32 to vector<8x1xf32>
    %27 = arith.subf %26, %25 : vector<8x1xf32>
    %28 = arith.mulf %27, %21 : vector<8x1xf32>
    %c1_i32 = arith.constant 1 : i32
    %29 = arith.muli %arg1, %c1_i32 : i32
    %30 = arith.addi %29, %arg0 : i32
    %c8_i32 = arith.constant 8 : i32
    %31 = arith.muli %30, %c8_i32 : i32
    %32 = tpu.iota {dimensions = array<i32: 0>} : vector<8x1xi32>
    %33 = vector.broadcast %31 : i32 to vector<8x1xi32>
    %34 = arith.addi %33, %32 : vector<8x1xi32>
    %c8_i32_9 = arith.constant 8 : i32
    %35 = vector.broadcast %c8_i32_9 : i32 to vector<8x1xi32>
    %36 = arith.cmpi slt, %34, %35 : vector<8x1xi32>
    %cst_10 = arith.constant 0.000000e+00 : f32
    %37 = vector.broadcast %cst_10 : f32 to vector<8x1xf32>
    %38 = arith.select %36, %28, %37 : vector<8x1xi1>, vector<8x1xf32>
    %c0_11 = arith.constant 0 : index
    %c0_12 = arith.constant 0 : index
    %c0_13 = arith.constant 0 : index
    %39 = vector.load %arg4[%c0_11, %c0_12, %c0_13] : memref<1x1x1xf32, #tpu.memory_space<vmem>>, vector<1x1x1xf32>
    %40 = vector.shape_cast %38 : vector<8x1xf32> to vector<1x8x1xf32>
    %cst_14 = arith.constant dense<0.000000e+00> : vector<1xf32>
    %41 = vector.multi_reduction <add>, %40, %cst_14 [1, 2] : vector<1x8x1xf32> to vector<1xf32>
    %42 = vector.shape_cast %41 : vector<1xf32> to vector<1x1x1xf32>
    %43 = vector.extract %42[0, 0, 0] : f32 from vector<1x1x1xf32>
    %44 = vector.broadcast %43 : f32 to vector<1x1x1xf32>
    %45 = arith.addf %39, %44 : vector<1x1x1xf32>
    %c0_15 = arith.constant 0 : index
    %c0_16 = arith.constant 0 : index
    %c0_17 = arith.constant 0 : index
    %46 = vector.load %arg4[%c0_15, %c0_16, %c0_17] : memref<1x1x1xf32, #tpu.memory_space<vmem>>, vector<1x1x1xf32>
    tpu.vector_store %arg4[%c0_15, %c0_16, %c0_17], %45 {strides = array<i32>} : memref<1x1x1xf32, #tpu.memory_space<vmem>>, vector<1x1x1xf32>,
    return
  }
  func.func @transform_0(%arg0: i32, %arg1: i32) -> (i32, i32) {
    %c0_i32 = arith.constant 0 : i32
    %c0_i32_0 = arith.constant 0 : i32
    return %arg1, %c0_i32 : i32, i32
  }
  func.func @transform_1(%arg0: i32, %arg1: i32) -> (i32, i32) {
    %c0_i32 = arith.constant 0 : i32
    %c0_i32_0 = arith.constant 0 : i32
    return %arg1, %c0_i32 : i32, i32
  }
  func.func @transform_2(%arg0: i32, %arg1: i32) -> (i32, i32, i32) {
    %c0_i32 = arith.constant 0 : i32
    %c0_i32_0 = arith.constant 0 : i32
    %c0_i32_1 = arith.constant 0 : i32
    return %arg0, %c0_i32, %c0_i32_0 : i32, i32, i32
  }
}

</mosaic_0001>

<bundles_post_ra>
// kernel: tpu_custom_call.1
= control target key start
LH: loop header
LB: loop body
LE: loop exit
PB: predicated region body
PF: predicated region fallthrough
CT: control target
= control target key end

     0   :  { %vm20_vm0 = vcmask 261120   ;;  %s153_s0 = inlined_call_operand.vmem [shape: s32[8,1], index: 0, kind: input, shape index: {}]   ;;  %s154_s1 = inlined_call_operand.vmem [shape: f32[8,32], index: 1, kind: input, shape index: {}]   ;;  %s155_s2 = inlined_call_operand.hbm [shape: f32[1,1,1], index: 2, kind: output, shape index: {}]  }
   0x1   :  { %v18_v0 = vld [vmem:[%s154_s1] sm:$0xff] }
   0x2   :  { %7 = vsyncpa [#allocation3], 0  ;;  %v21_v1 = vsel %vm20_vm0, %v18_v0, -inf  ;;  %v121_v2 = vmov 0   ;;  %v19_v3 = vld [vmem:[%s153_s0] sm:$0xff]  ;;  %v32_v7 = vlaneseq  ;;  %vm58_vm2 = vcmask 7168  }
   0x3   :  { %92 = vset.pattern.permute.xlu0 %v121_v2  ;;  %vm16_vm3 = vcmask 0   ;;  %v122_v26 = vmov 0.0   ;;  %s123_s0 = smov [#allocation2]  }
   0x4   :  { %22 = vmax.xlane.f32.xlu0 %v21_v1  ;;  %v33_v8 = vand.u32 127, %v32_v7  ;;  %17 = vst.msk [vmem:[#allocation2] sm:$0x1] %vm16_vm3, %v122_v26  ;;  %s79_s1 = sshll.u32 %s123_s0, 4  ;;  %s80_s1 = int_to_ptr.vmem [resolvable:$true] %s79_s1 }
   0x5   :  { %s99_s14 = scalar_lea.vmem %s80_s1, 16  ;;  %s103_s15 = scalar_lea.vmem %s80_s1, 32 }
   0x6   :  { %p100_p0 = scmp.ne.s32.totalorder %s80_s1, %s99_s14  ;;  %p104_p1 = scmp.lt.s32.totalorder %s80_s1, %s80_s1 }
   0x7   :  { %p105_p2 = scmp.lt.s32.totalorder %s103_s15, %s99_s14 }
   0x9   :  { %p106_p3 = por %p105_p2, %p104_p1 }
   0xb   :  { %v57_v34 = vld [vmem:[#allocation2] sm:$0x1]  ;;  %p107_p4 = pnand %p106_p3, %p100_p0 }
  0x1a   :  { %35 = vperm.xlu0 %92, %v19_v3  }
  0x8d   :  { %v23_v4 = vpop.xlane.xlu0 %22 }
  0x8e   :  { %v24_v5 = vsub.f32 %v18_v0, %v23_v4 }
  0x90   :  { %v25_v6 = vmul.f32 1.442695, %v24_v5 }
  0x92   :  { %93 = vpow2.f32 %v25_v6 }
  0x95   :  { %v36_v9 = vpop.permute.xlu0 %35 }
  0x96   :  { %vm37_vm1 = vcmp.eq.s32.totalorder %v33_v8, %v36_v9 }
  0x97   :  { %v38_v12 = vsel %vm37_vm1, %v24_v5, 0.0 }
  0x98   :  { %v39_v13 = vsel %vm20_vm0, %v38_v12, 0.0 }
  0x9f   :  { %v94_v10 = vpop.eup %93 }
  0xa0   :  { %v27_v11 = vsel %vm20_vm0, %v94_v10, 0.0 }
  0xa1   :  { %28 = vadd.xlane.f32.xlu1 %v27_v11 }
  0xa5   :  { %40 = vadd.xlane.f32.xlu1 %v39_v13 }
 0x12a   :  { %v29_v14 = vpop.xlane.xlu1 %28 }
 0x12b   :  { %95 = vlog2.f32 %v29_v14 }
 0x12e   :  { %v41_v17 = vpop.xlane.xlu1 %40 }
 0x138   :  { %v96_v15 = vpop.eup %95 }
 0x139   :  { %v31_v16 = vmul.f32 0.6931472, %v96_v15 }
 0x13b   :  { %v42_v18 = vsub.f32 %v41_v17, %v31_v16 }
 0x13d   :  { %v43_v19 = vmul.f32 1.442695, %v42_v18 }
 0x13f   :  { %97 = vpow2.f32 %v43_v19 }
 0x14c   :  { %v98_v20 = vpop.eup %97 }
 0x14d   :  { %v45_v21 = vsub.f32 1.0, %v98_v20 }
 0x14f   :  { %v46_v22 = vmul.f32 %v45_v21, %v45_v21 }
 0x151   :  { %v47_v23 = vsub.f32 0.0, %v46_v22 }
 0x153   :  { %v48_v24 = vmul.f32 %v47_v23, %v42_v18 }
 0x155   :  { %v59_v25 = vsel %vm58_vm2, %v48_v24, 0.0 }
 0x156   :  { %60 = vadd.xlane.f32.xlu1 %v59_v25 }
 0x1df   :  { %v61_v27 = vpop.xlane.xlu1 %60 }
 0x1e0   :  { %v62_v28 = vrot.slane %v61_v27, 4 }
 0x1e2   :  { %v63_v29 = vadd.f32 %v62_v28, %v61_v27 }
 0x1e4   :  { %v64_v30 = vrot.slane %v63_v29, 2 }
 0x1e6   :  { %v65_v31 = vadd.f32 %v64_v30, %v63_v29 }
 0x1e8   :  { %v66_v32 = vrot.slane %v65_v31, 1 }
 0x1ea   :  { %v67_v33 = vadd.f32 %v66_v32, %v65_v31 }
 0x1ec   :  { %87 = vpush %v67_v33 }
 0x21d   :  { %s88_s13 = spop %87 }
 0x21e   :  { %v69_v35 = vstv %s88_s13 }
 0x21f   :  { %v70_v36 = vadd.f32 %v69_v35, %v57_v34 }
 0x221   :  { %72 = vst.msk [vmem:[#allocation2] sm:$0x1] %vm16_vm3, %v70_v36 }
 0x222   :  { %110 = shalt.err (!%p107_p4)
}
 0x223   :  { %82 = dma.vmem_to_hbm [thread:$0]  %s80_s1, 16, %s155_s2, [#allocation3]  }
 0x224   :  { %119 = dma.done.wait [#allocation3], 16  }
 0x225   :  { %120 = vsyncadd [#allocation3], 4294967280 }
 0x226   :  { %86 = vsyncpa [#allocation3], 1 }

</bundles_post_ra>
